<compile_context>
chip_gen: v6e
topology: v6e:2x2x1
jax: 0.10.0
libtpu: 0.0.40
codegen_flags: <defaults>
</compile_context>

<pallas_src>
import functools

import jax
import jax.numpy as jnp
from jax.experimental import pallas as pl
from jax.experimental.pallas import tpu as pltpu


# ----------------------------------------------------------------------------
# Fused Pallas kernel: all GIN layers + global_add_pool + Linear + clamp
# ----------------------------------------------------------------------------
def fused_gin_kernel(h0_ref, gather_ref, scatter_ref, pool_ref,
                     eemb_ref, eps_ref,
                     w1_ref, s1_ref, w2_ref, s2_ref,
                     wp_ref, bp_ref,
                     out_ref, h_scratch):
    l = pl.program_id(0)
    last = pl.num_programs(0) - 1

    @pl.when(l == 0)
    def _init():                                           # h resident in VMEM
        h_scratch[...] = h0_ref[...]

    h = h_scratch[...]                                     # (N, D) f32
    h_bf = h.astype(jnp.bfloat16)

    # message: relu(h[src_e] + bond_emb_e)  -- gather via one-hot matmul (MXU)
    msg = jnp.dot(gather_ref[...], h_bf,
                  preferred_element_type=jnp.float32) + eemb_ref[...]
    msg = jnp.maximum(msg, 0.0)                            # (E, D)
    # aggregation: sum over incoming edges -- scatter-add via one-hot matmul
    agg = jnp.dot(scatter_ref[...], msg.astype(jnp.bfloat16),
                  preferred_element_type=jnp.float32)      # (N, D)

    x = eps_ref[l] * h + agg                               # (1+eps)*h + sum
    # GIN MLP; eval-mode BatchNorms + biases folded into w/shift host-side.
    z = jnp.dot(x.astype(jnp.bfloat16), w1_ref[...],
                preferred_element_type=jnp.float32) + s1_ref[...]
    z = jnp.maximum(z, 0.0)
    z = jnp.dot(z.astype(jnp.bfloat16), w2_ref[...],
                preferred_element_type=jnp.float32) + s2_ref[...]

    @pl.when(l != last)   # JK='last', drop_ratio=0: ReLU on all but final layer
    def _carry():
        h_scratch[...] = jnp.maximum(z, 0.0)

    @pl.when(l == last)   # epilogue: global_add_pool + Linear + clamp[0, 50]
    def _finalize():
        g = jnp.dot(pool_ref[...], z.astype(jnp.bfloat16),
                    preferred_element_type=jnp.float32)    # (G, D)
        out = jnp.dot(g.astype(jnp.bfloat16), wp_ref[...],
                      preferred_element_type=jnp.float32) + bp_ref[...]
        out_ref[...] = jnp.clip(out, 0.0, 50.0)


# ----------------------------------------------------------------------------
# Host-side wrapper (glue: embedding lookups, one-hot build, BN folding, pad)
# ----------------------------------------------------------------------------
def _round_up(x, m):
    return (x + m - 1) // m * m


def _pad2(x, rows, cols):
    return jnp.pad(x, ((0, rows - x.shape[0]), (0, cols - x.shape[1])))


def net_forward(params, node_feat, edge_feat, edge_index, batch, num_graphs):
    """Eval-mode forward of Net; returns [out] like the PyTorch module."""
    n = node_feat.shape[0]
    e = edge_feat.shape[0]
    d = params["atom_emb"][0].shape[1]
    t = params["w_pred"].shape[1]
    layers = params["layers"]
    num_layers = len(layers)

    n_pad = _round_up(n, 8)
    e_pad = _round_up(e, 8)
    d_pad = _round_up(d, 128)        # lane-dense feature dim
    hh_pad = _round_up(2 * d, 128)   # lane-dense hidden dim
    t_pad = _round_up(t, 128)        # lane-dense prediction dim

    # AtomEncoder: sum of per-feature embedding lookups (glue, gather).
    h0 = jnp.zeros((n, d), jnp.float32)
    for i, tbl in enumerate(params["atom_emb"]):
        h0 = h0 + jnp.take(tbl, node_feat[:, i], axis=0)
    h0 = _pad2(h0, n_pad, d_pad)

    # BondEncoder for every layer, hoisted out of the layer loop and stacked.
    eembs = []
    for lp in layers:
        ee = jnp.zeros((e, d), jnp.float32)
        for i, tbl in enumerate(lp["bond_emb"]):
            ee = ee + jnp.take(tbl, edge_feat[:, i], axis=0)
        eembs.append(_pad2(ee, e_pad, d_pad))
    eemb_stack = jnp.stack(eembs)                               # (L, E, D)

    # Dense one-hot operators (bf16 is exact for 0/1); padded rows/cols are 0.
    src, dst = edge_index[0], edge_index[1]
    gather = _pad2(jax.nn.one_hot(src, n_pad, dtype=jnp.float32),
                   e_pad, n_pad).astype(jnp.bfloat16)           # (E, N)
    scatter = _pad2(jax.nn.one_hot(dst, n_pad, dtype=jnp.float32).T,
                    n_pad, e_pad).astype(jnp.bfloat16)          # (N, E)
    pool = _pad2(jax.nn.one_hot(batch, num_graphs, dtype=jnp.float32).T,
                 num_graphs, n_pad).astype(jnp.bfloat16)        # (G, N)

    # Fold eval-mode BN scale/shift + biases into the weights, pad, stack.
    w1s, s1s, w2s, s2s, epss = [], [], [], [], []
    for lp in layers:
        w1s.append(_pad2(lp["w1"] * lp["s1"], d_pad, hh_pad).astype(jnp.bfloat16))
        s1s.append(_pad2(lp["b1"] * lp["s1"] + lp["t1"], 1, hh_pad))
        w2s.append(_pad2(lp["w2"] * lp["s2"], hh_pad, d_pad).astype(jnp.bfloat16))
        s2s.append(_pad2(lp["b2"] * lp["s2"] + lp["t2"], 1, d_pad))
        epss.append(1.0 + lp["eps"][0, 0])
    w1_stack = jnp.stack(w1s)                                   # (L, D, 2D)
    s1_stack = jnp.stack(s1s)                                   # (L, 1, 2D)
    w2_stack = jnp.stack(w2s)                                   # (L, 2D, D)
    s2_stack = jnp.stack(s2s)                                   # (L, 1, D)
    eps_vec = jnp.stack(epss).astype(jnp.float32)               # (L,) = 1+eps

    w_pred = _pad2(params["w_pred"], d_pad, t_pad).astype(jnp.bfloat16)
    b_pred = _pad2(params["b_pred"], 1, t_pad)

    flops = (2 * num_layers * (2 * e_pad * n_pad * d_pad
                               + 2 * n_pad * d_pad * hh_pad)
             + 2 * (num_graphs * n_pad * d_pad + num_graphs * d_pad * t_pad))
    bytes_accessed = sum(int(a.size * a.dtype.itemsize) for a in
                         (h0, gather, scatter, pool, eemb_stack, eps_vec,
                          w1_stack, s1_stack, w2_stack, s2_stack,
                          w_pred, b_pred)) + num_graphs * t_pad * 4

    const = lambda i: (0, 0)   # layer-invariant block -> single DMA, resident
    per_layer = lambda shp: pl.BlockSpec((None,) + shp, lambda i: (i, 0, 0))

    out = pl.pallas_call(
        fused_gin_kernel,
        out_shape=jax.ShapeDtypeStruct((num_graphs, t_pad), jnp.float32),
        grid_spec=pltpu.PrefetchScalarGridSpec(
            num_scalar_prefetch=0,
            grid=(num_layers,),
            in_specs=[
                pl.BlockSpec((n_pad, d_pad), const),            # h0
                pl.BlockSpec((e_pad, n_pad), const),            # gather one-hot
                pl.BlockSpec((n_pad, e_pad), const),            # scatter one-hot
                pl.BlockSpec((num_graphs, n_pad), const),       # pool one-hot
                per_layer((e_pad, d_pad)),                      # bond emb (per L)
                pl.BlockSpec(memory_space=pltpu.MemorySpace.SMEM),  # 1+eps (L,)
                per_layer((d_pad, hh_pad)),                     # w1 (BN-folded)
                per_layer((1, hh_pad)),                         # shift1
                per_layer((hh_pad, d_pad)),                     # w2 (BN-folded)
                per_layer((1, d_pad)),                          # shift2
                pl.BlockSpec((d_pad, t_pad), const),            # w_pred
                pl.BlockSpec((1, t_pad), const),                # b_pred
            ],
            out_specs=pl.BlockSpec((num_graphs, t_pad), const),
            scratch_shapes=[pltpu.VMEM((n_pad, d_pad), jnp.float32)],  # h carry
        ),
        compiler_params=pltpu.CompilerParams(
            dimension_semantics=("arbitrary",)),
        cost_estimate=pl.CostEstimate(flops=flops, transcendentals=0,
                                      bytes_accessed=bytes_accessed),
    )(h0, gather, scatter, pool, eemb_stack, eps_vec,
      w1_stack, s1_stack, w2_stack, s2_stack, w_pred, b_pred)

    out = out[:, :t]
    # TODO(synk): noisy_node / training-mode branches (dropout, no clamp,
    # virtual node) are not exercised; this implements the eval-mode path.
    return [out]


# ----------------------------------------------------------------------------
# Parameter init (deterministic, synthetic)
# ----------------------------------------------------------------------------
def init_params(key, emb_dim, num_tasks, num_layers,
                num_atom_feats=3, atom_vocab=10,
                num_bond_feats=2, bond_vocab=5):
    def nxt():
        nonlocal key
        key, sub = jax.random.split(key)
        return sub

    def folded_bn(dim):
        gamma = 1.0 + 0.1 * jax.random.normal(nxt(), (1, dim), jnp.float32)
        beta = 0.1 * jax.random.normal(nxt(), (1, dim), jnp.float32)
        mean = 0.1 * jax.random.normal(nxt(), (1, dim), jnp.float32)
        var = 1.0 + 0.1 * jax.random.uniform(nxt(), (1, dim), jnp.float32)
        scale = gamma / jnp.sqrt(var + 1e-5)
        shift = beta - mean * scale
        return scale, shift

    atom_emb = [0.1 * jax.random.normal(nxt(), (atom_vocab, emb_dim), jnp.float32)
                for _ in range(num_atom_feats)]
    layers = []
    for _ in range(num_layers):
        bond_emb = [0.1 * jax.random.normal(nxt(), (bond_vocab, emb_dim), jnp.float32)
                    for _ in range(num_bond_feats)]
        w1 = jax.random.normal(nxt(), (emb_dim, 2 * emb_dim), jnp.float32) / jnp.sqrt(
            jnp.float32(emb_dim))
        b1 = 0.01 * jax.random.normal(nxt(), (1, 2 * emb_dim), jnp.float32)
        s1, t1 = folded_bn(2 * emb_dim)
        w2 = jax.random.normal(nxt(), (2 * emb_dim, emb_dim), jnp.float32) / jnp.sqrt(
            jnp.float32(2 * emb_dim))
        b2 = 0.01 * jax.random.normal(nxt(), (1, emb_dim), jnp.float32)
        s2, t2 = folded_bn(emb_dim)
        eps = jnp.zeros((1, 1), jnp.float32)  # GIN eps, init 0 as in torch
        layers.append(dict(bond_emb=bond_emb, eps=eps,
                           w1=w1, b1=b1, s1=s1, t1=t1,
                           w2=w2, b2=b2, s2=s2, t2=t2))
    w_pred = jax.random.normal(nxt(), (emb_dim, num_tasks), jnp.float32) / jnp.sqrt(
        jnp.float32(emb_dim))
    b_pred = jnp.zeros((1, num_tasks), jnp.float32)
    return dict(atom_emb=atom_emb, layers=layers,
                w_pred=w_pred, b_pred=b_pred), key


if __name__ == "__main__":
    key = jax.random.PRNGKey(0)
    N, E, G = 16, 32, 2          # nodes, edges, graphs
    EMB, TASKS, LAYERS = 32, 1, 5

    params, key = init_params(key, EMB, TASKS, LAYERS)
    k1, k2, k3, k4 = jax.random.split(key, 4)
    node_feat = jax.random.randint(k1, (N, 3), 0, 10, dtype=jnp.int32)
    edge_feat = jax.random.randint(k2, (E, 2), 0, 5, dtype=jnp.int32)
    src = jax.random.randint(k3, (E,), 0, N, dtype=jnp.int32)
    dst = jax.random.randint(k4, (E,), 0, N, dtype=jnp.int32)
    edge_index = jnp.stack([src, dst])                           # (2, E)
    batch = jnp.concatenate([jnp.zeros(N // 2, jnp.int32),
                             jnp.ones(N - N // 2, jnp.int32)])   # (N,)

    fwd = jax.jit(net_forward, static_argnums=(5,))
    out = fwd(params, node_feat, edge_feat, edge_index, batch, G)
    jax.block_until_ready(out[0])
    assert out[0].shape == (G, TASKS) and out[0].dtype == jnp.float32
    assert bool(jnp.all(out[0] >= 0.0)) and bool(jnp.all(out[0] <= 50.0))
    print("KERNEL_OK")
</pallas_src>

<mosaic_0001>
module attributes {stable_mosaic.version = 11 : i64} {
  func.func @fused_gin_kernel(%arg0: i32, %arg1: memref<16x128xf32, #tpu.memory_space<vmem>>, %arg2: memref<32x16xbf16, #tpu.memory_space<vmem>>, %arg3: memref<16x32xbf16, #tpu.memory_space<vmem>>, %arg4: memref<2x16xbf16, #tpu.memory_space<vmem>>, %arg5: memref<1x32x128xf32, #tpu.memory_space<vmem>>, %arg6: memref<5xf32, #tpu.memory_space<smem>>, %arg7: memref<1x128x128xbf16, #tpu.memory_space<vmem>>, %arg8: memref<1x1x128xf32, #tpu.memory_space<vmem>>, %arg9: memref<1x128x128xbf16, #tpu.memory_space<vmem>>, %arg10: memref<1x1x128xf32, #tpu.memory_space<vmem>>, %arg11: memref<128x128xbf16, #tpu.memory_space<vmem>>, %arg12: memref<1x128xf32, #tpu.memory_space<vmem>>, %arg13: memref<2x128xf32, #tpu.memory_space<vmem>>, %arg14: memref<16x128xf32, #tpu.memory_space<vmem>>) attributes {dimension_semantics = [#tpu.dimension_semantics<arbitrary>], iteration_bounds = array<i64: 5>, scalar_prefetch = 0 : i64, scratch_operands = 1 : i64, tpu.core_type = #tpu.core_type<tc>, window_params = [{pipeline_mode = #tpu.pipeline_mode<synchronous>, transform_indices = @transform_0, window_bounds = array<i64: 16, 128>}, {pipeline_mode = #tpu.pipeline_mode<synchronous>, transform_indices = @transform_1, window_bounds = array<i64: 32, 16>}, {pipeline_mode = #tpu.pipeline_mode<synchronous>, transform_indices = @transform_2, window_bounds = array<i64: 16, 32>}, {pipeline_mode = #tpu.pipeline_mode<synchronous>, transform_indices = @transform_3, window_bounds = array<i64: 2, 16>}, {transform_indices = @transform_4, window_bounds = array<i64: 1, 32, 128>}, {transform_indices = @transform_5, window_bounds = array<i64: 5>}, {transform_indices = @transform_6, window_bounds = array<i64: 1, 128, 128>}, {transform_indices = @transform_7, window_bounds = array<i64: 1, 1, 128>}, {transform_indices = @transform_8, window_bounds = array<i64: 1, 128, 128>}, {transform_indices = @transform_9, window_bounds = array<i64: 1, 1, 128>}, {pipeline_mode = #tpu.pipeline_mode<synchronous>, transform_indices = @transform_10, window_bounds = array<i64: 128, 128>}, {pipeline_mode = #tpu.pipeline_mode<synchronous>, transform_indices = @transform_11, window_bounds = array<i64: 1, 128>}, {pipeline_mode = #tpu.pipeline_mode<synchronous>, transform_indices = @transform_12, window_bounds = array<i64: 2, 128>}]} {
    %c0_i32 = arith.constant 0 : i32
    %0 = arith.cmpi eq, %arg0, %c0_i32 : i32
    %1 = arith.extui %0 : i1 to i32
    %c0_i32_0 = arith.constant 0 : i32
    %2 = arith.cmpi ne, %1, %c0_i32_0 : i32
    scf.if %2 {
      %c0_29 = arith.constant 0 : index
      %c0_30 = arith.constant 0 : index
      %44 = vector.load %arg1[%c0_29, %c0_30] : memref<16x128xf32, #tpu.memory_space<vmem>>, vector<16x128xf32>
      %c0_31 = arith.constant 0 : index
      %c0_32 = arith.constant 0 : index
      %45 = vector.load %arg14[%c0_31, %c0_32] : memref<16x128xf32, #tpu.memory_space<vmem>>, vector<16x128xf32>
      tpu.vector_store %arg14[%c0_31, %c0_32], %44 {strides = array<i32>} : memref<16x128xf32, #tpu.memory_space<vmem>>, vector<16x128xf32>,
    } else {
    }
    %c0 = arith.constant 0 : index
    %c0_1 = arith.constant 0 : index
    %3 = vector.load %arg14[%c0, %c0_1] : memref<16x128xf32, #tpu.memory_space<vmem>>, vector<16x128xf32>
    %4 = arith.truncf %3 : vector<16x128xf32> to vector<16x128xbf16>
    %c0_2 = arith.constant 0 : index
    %c0_3 = arith.constant 0 : index
    %5 = vector.load %arg2[%c0_2, %c0_3] : memref<32x16xbf16, #tpu.memory_space<vmem>>, vector<32x16xbf16>
    %cst = arith.constant dense<0.000000e+00> : vector<32x128xf32>
    %6 = tpu.matmul %5, %4, %cst {dimension_numbers = #tpu.dot_dimension_numbers<[1], [0], [0], [1], [0, 0, 1, 1], [], []>} : vector<32x16xbf16>, vector<16x128xbf16>, vector<32x128xf32> -> vector<32x128xf32>
    %c0_4 = arith.constant 0 : index
    %c0_5 = arith.constant 0 : index
    %c0_6 = arith.constant 0 : index
    %7 = vector.load %arg5[%c0_4, %c0_5, %c0_6] : memref<1x32x128xf32, #tpu.memory_space<vmem>>, vector<1x32x128xf32>
    %8 = vector.shape_cast %7 : vector<1x32x128xf32> to vector<32x128xf32>
    %9 = arith.addf %6, %8 : vector<32x128xf32>
    %cst_7 = arith.constant 0.000000e+00 : f32
    %10 = vector.broadcast %cst_7 : f32 to vector<32x128xf32>
    %11 = arith.maximumf %9, %10 : vector<32x128xf32>
    %c0_8 = arith.constant 0 : index
    %c0_9 = arith.constant 0 : index
    %12 = vector.load %arg3[%c0_8, %c0_9] : memref<16x32xbf16, #tpu.memory_space<vmem>>, vector<16x32xbf16>
    %13 = arith.truncf %11 : vector<32x128xf32> to vector<32x128xbf16>
    %cst_10 = arith.constant dense<0.000000e+00> : vector<16x128xf32>
    %14 = tpu.matmul %12, %13, %cst_10 {dimension_numbers = #tpu.dot_dimension_numbers<[1], [0], [0], [1], [0, 0, 1, 1], [], []>} : vector<16x32xbf16>, vector<32x128xbf16>, vector<16x128xf32> -> vector<16x128xf32>
    %15 = arith.index_cast %arg0 : i32 to index
    %16 = memref.load %arg6[%15] : memref<5xf32, #tpu.memory_space<smem>>
    %17 = vector.broadcast %16 : f32 to vector<16x128xf32>
    %18 = arith.mulf %17, %3 : vector<16x128xf32>
    %19 = arith.addf %18, %14 : vector<16x128xf32>
    %20 = arith.truncf %19 : vector<16x128xf32> to vector<16x128xbf16>
    %c0_11 = arith.constant 0 : index
    %c0_12 = arith.constant 0 : index
    %c0_13 = arith.constant 0 : index
    %21 = vector.load %arg7[%c0_11, %c0_12, %c0_13] : memref<1x128x128xbf16, #tpu.memory_space<vmem>>, vector<1x128x128xbf16>
    %22 = vector.shape_cast %21 : vector<1x128x128xbf16> to vector<128x128xbf16>
    %cst_14 = arith.constant dense<0.000000e+00> : vector<16x128xf32>
    %23 = tpu.matmul %20, %22, %cst_14 {dimension_numbers = #tpu.dot_dimension_numbers<[1], [0], [0], [1], [0, 0, 1, 1], [], []>} : vector<16x128xbf16>, vector<128x128xbf16>, vector<16x128xf32> -> vector<16x128xf32>
    %c0_15 = arith.constant 0 : index
    %c0_16 = arith.constant 0 : index
    %c0_17 = arith.constant 0 : index
    %24 = vector.load %arg8[%c0_15, %c0_16, %c0_17] : memref<1x1x128xf32, #tpu.memory_space<vmem>>, vector<1x1x128xf32>
    %25 = vector.shape_cast %24 : vector<1x1x128xf32> to vector<1x128xf32>
    %26 = vector.broadcast %25 : vector<1x128xf32> to vector<16x128xf32>
    %27 = arith.addf %23, %26 : vector<16x128xf32>
    %cst_18 = arith.constant 0.000000e+00 : f32
    %28 = vector.broadcast %cst_18 : f32 to vector<16x128xf32>
    %29 = arith.maximumf %27, %28 : vector<16x128xf32>
    %30 = arith.truncf %29 : vector<16x128xf32> to vector<16x128xbf16>
    %c0_19 = arith.constant 0 : index
    %c0_20 = arith.constant 0 : index
    %c0_21 = arith.constant 0 : index
    %31 = vector.load %arg9[%c0_19, %c0_20, %c0_21] : memref<1x128x128xbf16, #tpu.memory_space<vmem>>, vector<1x128x128xbf16>
    %32 = vector.shape_cast %31 : vector<1x128x128xbf16> to vector<128x128xbf16>
    %cst_22 = arith.constant dense<0.000000e+00> : vector<16x128xf32>
    %33 = tpu.matmul %30, %32, %cst_22 {dimension_numbers = #tpu.dot_dimension_numbers<[1], [0], [0], [1], [0, 0, 1, 1], [], []>} : vector<16x128xbf16>, vector<128x128xbf16>, vector<16x128xf32> -> vector<16x128xf32>
    %c0_23 = arith.constant 0 : index
    %c0_24 = arith.constant 0 : index
    %c0_25 = arith.constant 0 : index
    %34 = vector.load %arg10[%c0_23, %c0_24, %c0_25] : memref<1x1x128xf32, #tpu.memory_space<vmem>>, vector<1x1x128xf32>
    %35 = vector.shape_cast %34 : vector<1x1x128xf32> to vector<1x128xf32>
    %36 = vector.broadcast %35 : vector<1x128xf32> to vector<16x128xf32>
    %37 = arith.addf %33, %36 : vector<16x128xf32>
    %c4_i32 = arith.constant 4 : i32
    %38 = arith.cmpi ne, %arg0, %c4_i32 : i32
    %39 = arith.extui %38 : i1 to i32
    %c0_i32_26 = arith.constant 0 : i32
    %40 = arith.cmpi ne, %39, %c0_i32_26 : i32
    scf.if %40 {
      %cst_29 = arith.constant 0.000000e+00 : f32
      %44 = vector.broadcast %cst_29 : f32 to vector<16x128xf32>
      %45 = arith.maximumf %37, %44 : vector<16x128xf32>
      %c0_30 = arith.constant 0 : index
      %c0_31 = arith.constant 0 : index
      %46 = vector.load %arg14[%c0_30, %c0_31] : memref<16x128xf32, #tpu.memory_space<vmem>>, vector<16x128xf32>
      tpu.vector_store %arg14[%c0_30, %c0_31], %45 {strides = array<i32>} : memref<16x128xf32, #tpu.memory_space<vmem>>, vector<16x128xf32>,
    } else {
    }
    %c4_i32_27 = arith.constant 4 : i32
    %41 = arith.cmpi eq, %arg0, %c4_i32_27 : i32
    %42 = arith.extui %41 : i1 to i32
    %c0_i32_28 = arith.constant 0 : i32
    %43 = arith.cmpi ne, %42, %c0_i32_28 : i32
    scf.if %43 {
      %c0_29 = arith.constant 0 : index
      %c0_30 = arith.constant 0 : index
      %44 = vector.load %arg4[%c0_29, %c0_30] : memref<2x16xbf16, #tpu.memory_space<vmem>>, vector<2x16xbf16>
      %45 = arith.truncf %37 : vector<16x128xf32> to vector<16x128xbf16>
      %cst_31 = arith.constant dense<0.000000e+00> : vector<2x128xf32>
      %46 = tpu.matmul %44, %45, %cst_31 {dimension_numbers = #tpu.dot_dimension_numbers<[1], [0], [0], [1], [0, 0, 1, 1], [], []>} : vector<2x16xbf16>, vector<16x128xbf16>, vector<2x128xf32> -> vector<2x128xf32>
      %47 = arith.truncf %46 : vector<2x128xf32> to vector<2x128xbf16>
      %c0_32 = arith.constant 0 : index
      %c0_33 = arith.constant 0 : index
      %48 = vector.load %arg11[%c0_32, %c0_33] : memref<128x128xbf16, #tpu.memory_space<vmem>>, vector<128x128xbf16>
      %cst_34 = arith.constant dense<0.000000e+00> : vector<2x128xf32>
      %49 = tpu.matmul %47, %48, %cst_34 {dimension_numbers = #tpu.dot_dimension_numbers<[1], [0], [0], [1], [0, 0, 1, 1], [], []>} : vector<2x128xbf16>, vector<128x128xbf16>, vector<2x128xf32> -> vector<2x128xf32>
      %c0_35 = arith.constant 0 : index
      %c0_36 = arith.constant 0 : index
      %50 = vector.load %arg12[%c0_35, %c0_36] : memref<1x128xf32, #tpu.memory_space<vmem>>, vector<1x128xf32>
      %51 = vector.broadcast %50 : vector<1x128xf32> to vector<2x128xf32>
      %52 = arith.addf %49, %51 : vector<2x128xf32>
      %cst_37 = arith.constant 0.000000e+00 : f32
      %cst_38 = arith.constant 5.000000e+01 : f32
      %53 = vector.broadcast %cst_37 : f32 to vector<2x128xf32>
      %54 = arith.maximumf %53, %52 : vector<2x128xf32>
      %55 = vector.broadcast %cst_38 : f32 to vector<2x128xf32>
      %56 = arith.minimumf %55, %54 : vector<2x128xf32>
      %c0_39 = arith.constant 0 : index
      %c0_40 = arith.constant 0 : index
      %57 = vector.load %arg13[%c0_39, %c0_40] : memref<2x128xf32, #tpu.memory_space<vmem>>, vector<2x128xf32>
      tpu.vector_store %arg13[%c0_39, %c0_40], %56 {strides = array<i32>} : memref<2x128xf32, #tpu.memory_space<vmem>>, vector<2x128xf32>,
    } else {
    }
    return
  }
  func.func @transform_0(%arg0: i32) -> (i32, i32) {
    %c0_i32 = arith.constant 0 : i32
    %c0_i32_0 = arith.constant 0 : i32
    %c0_i32_1 = arith.constant 0 : i32
    return %c0_i32, %c0_i32_0 : i32, i32
  }
  func.func @transform_1(%arg0: i32) -> (i32, i32) {
    %c0_i32 = arith.constant 0 : i32
    %c0_i32_0 = arith.constant 0 : i32
    %c0_i32_1 = arith.constant 0 : i32
    return %c0_i32, %c0_i32_0 : i32, i32
  }
  func.func @transform_2(%arg0: i32) -> (i32, i32) {
    %c0_i32 = arith.constant 0 : i32
    %c0_i32_0 = arith.constant 0 : i32
    %c0_i32_1 = arith.constant 0 : i32
    return %c0_i32, %c0_i32_0 : i32, i32
  }
  func.func @transform_3(%arg0: i32) -> (i32, i32) {
    %c0_i32 = arith.constant 0 : i32
    %c0_i32_0 = arith.constant 0 : i32
    %c0_i32_1 = arith.constant 0 : i32
    return %c0_i32, %c0_i32_0 : i32, i32
  }
  func.func @transform_4(%arg0: i32) -> (i32, i32, i32) {
    %c0_i32 = arith.constant 0 : i32
    %c0_i32_0 = arith.constant 0 : i32
    %c0_i32_1 = arith.constant 0 : i32
    return %arg0, %c0_i32, %c0_i32_0 : i32, i32, i32
  }
  func.func @transform_5(%arg0: i32) -> i32 {
    %c0_i32 = arith.constant 0 : i32
    %c0_i32_0 = arith.constant 0 : i32
    return %c0_i32 : i32
  }
  func.func @transform_6(%arg0: i32) -> (i32, i32, i32) {
    %c0_i32 = arith.constant 0 : i32
    %c0_i32_0 = arith.constant 0 : i32
    %c0_i32_1 = arith.constant 0 : i32
    return %arg0, %c0_i32, %c0_i32_0 : i32, i32, i32
  }
  func.func @transform_7(%arg0: i32) -> (i32, i32, i32) {
    %c0_i32 = arith.constant 0 : i32
    %c0_i32_0 = arith.constant 0 : i32
    %c0_i32_1 = arith.constant 0 : i32
    return %arg0, %c0_i32, %c0_i32_0 : i32, i32, i32
  }
  func.func @transform_8(%arg0: i32) -> (i32, i32, i32) {
    %c0_i32 = arith.constant 0 : i32
    %c0_i32_0 = arith.constant 0 : i32
    %c0_i32_1 = arith.constant 0 : i32
    return %arg0, %c0_i32, %c0_i32_0 : i32, i32, i32
  }
  func.func @transform_9(%arg0: i32) -> (i32, i32, i32) {
    %c0_i32 = arith.constant 0 : i32
    %c0_i32_0 = arith.constant 0 : i32
    %c0_i32_1 = arith.constant 0 : i32
    return %arg0, %c0_i32, %c0_i32_0 : i32, i32, i32
  }
  func.func @transform_10(%arg0: i32) -> (i32, i32) {
    %c0_i32 = arith.constant 0 : i32
    %c0_i32_0 = arith.constant 0 : i32
    %c0_i32_1 = arith.constant 0 : i32
    return %c0_i32, %c0_i32_0 : i32, i32
  }
  func.func @transform_11(%arg0: i32) -> (i32, i32) {
    %c0_i32 = arith.constant 0 : i32
    %c0_i32_0 = arith.constant 0 : i32
    %c0_i32_1 = arith.constant 0 : i32
    return %c0_i32, %c0_i32_0 : i32, i32
  }
  func.func @transform_12(%arg0: i32) -> (i32, i32) {
    %c0_i32 = arith.constant 0 : i32
    %c0_i32_0 = arith.constant 0 : i32
    %c0_i32_1 = arith.constant 0 : i32
    return %c0_i32, %c0_i32_0 : i32, i32
  }
}

</mosaic_0001>

<bundles_post_ra>
// kernel: net_forward.1
= control target key start
LH: loop header
LB: loop body
LE: loop exit
PB: predicated region body
PF: predicated region fallthrough
CT: control target
= control target key end

     0   :  { %s1608_s0 = inlined_call_operand.vmem [shape: f32[16,128], index: 0, kind: input, shape index: {}]   ;;  %s1609_s1 = inlined_call_operand.vmem [shape: bf16[32,16], index: 1, kind: input, shape index: {}]   ;;  %s1610_s2 = inlined_call_operand.vmem [shape: bf16[16,32], index: 2, kind: input, shape index: {}]   ;;  %s1611_s3 = inlined_call_operand.vmem [shape: bf16[2,16], index: 3, kind: input, shape index: {}]   ;;  %s1612_s4 = inlined_call_operand.vmem [shape: f32[5,32,128], index: 4, kind: input, shape index: {}]   ;;  %s1613_s5 = inlined_call_operand.vmem [shape: f32[5], index: 5, kind: input, shape index: {}]   ;;  %s1614_s6 = inlined_call_operand.vmem [shape: bf16[5,128,128], index: 6, kind: input, shape index: {}]   ;;  %s1615_s7 = inlined_call_operand.vmem [shape: f32[5,1,128], index: 7, kind: input, shape index: {}]   ;;  %s1616_s8 = inlined_call_operand.vmem [shape: bf16[5,128,128], index: 8, kind: input, shape index: {}]   ;;  %s1617_s9 = inlined_call_operand.vmem [shape: f32[5,1,128], index: 9, kind: input, shape index: {}]   ;;  %s1618_s10 = inlined_call_operand.vmem [shape: bf16[128,128], index: 10, kind: input, shape index: {}]   ;;  %s1619_s11 = inlined_call_operand.vmem [shape: f32[1,128], index: 11, kind: input, shape index: {}]   ;;  %s1620_s12 = inlined_call_operand.vmem [shape: f32[2,128], index: 12, kind: output, shape index: {}]  }
   0x1   :  { %1621 = sst [smem:[#allocation6_spill]] %s1613_s5 }
   0x2   :  { %17 = vsyncpa [#allocation4], 0  ;;  %s1429_s21 = smov 0  }
   0x3 LB: > { %s1435_s22 = sadd.s32 4294967295, %s1357_s21   ;;  %p1114_p0 = scmp.ge.s32.totalorder %s1357_s21, 1  ;;  %s1357_s21 = sphi %s1429_s21, %s23_s21  }
   0x4   : > { %p326_p1 = scmp.lt.s32.totalorder %s1357_s21, 6  ;;  %s1622_s5 = sld [smem:[#allocation6_spill]] }
   0x5   : > { %p1290_p4 = scmp.eq.s32.totalorder %s1435_s22, 0 }
   0x6   : > { %p1443_p3 = pnand %p1114_p0, %p326_p1 }
   0x8   : > { %p1286_p5 = pneg %p1443_p3 }
   0xa   : > { %s351_s25 = sshll.u32 %s1622_s5, 4  ;;  %p1287_p6 = pnand %p1290_p4, %p1286_p5  ;;  %s352_s25 = int_to_ptr.vmem [resolvable:$true] %s351_s25 }
   0xb   : > { %s1332_s27 = scalar_lea.vmem %s352_s25, 16  ;;  %p1340_p11 = scmp.lt.s32.totalorder %s352_s25, %s352_s25 }
   0xc   : > { %p1333_p7 = scmp.ne.s32.totalorder %s352_s25, %s1332_s27  ;;  %p1334_p8 = pneg %p1287_p6 }
   0xd   : > { %p1341_p12 = scmp.lt.s32.totalorder %s1332_s27, %s1332_s27 }
   0xe   : > { %p1335_p9 = pnand %p1334_p8, %p1333_p7 }
   0xf   : > { %p1342_p13 = por %p1341_p12, %p1340_p11 }
  0x10   : > { %p1336_p10 = pneg %p1335_p9 }
  0x12   : > { %p1343_p2 = pnand %p1342_p13, %p1336_p10 }
  0x14   : > { %1346 = shalt.err (!%p1343_p2)
}
  0x15   : > { %s1359_s28 = smov [#allocation3]   ;;  %406 = sbr.rel (%p1443_p3) target bundleno = 1275 (0x4fb), region = 68 }
  0x16   : > { %1289 = dma.vmem_to_smem (!%p1287_p6), %s352_s25, 16, %s1359_s28, [#allocation4]  }
  0x1a   : > { %1352 = dma.done.wait (%p1290_p4), [#allocation4], 16  }
  0x1b   : > { %1354 = vsyncadd (%p1290_p4), [#allocation4], 4294967280 }
  0x1c   : > { %412 = sfence }
  0x1d   : > { %p460_p0 = scmp.lt.s32.totalorder %s1435_s22, 4  ;;  %p1624_p1 = scmp.ne.s32.totalorder %s1435_s22, 0 }
  0x1f   : > { %s1460_s29 = scalar_select %p460_p0, %s1435_s22, 4 }
  0x20   : > { %485 = sbr.rel (%p1624_p1) target bundleno = 39 (0x27), region = 76 }
  0x21   : > { %s1164_s30 = sshll.u32 %s1460_s29, 5  ;;  %s1165_s13 = sshll.u32 %s1460_s29, 6 }
  0x22   : > { %s1467_s16 = scalar_lea.vmem %s1612_s4, %s1164_s30  ;;  %s1472_s19 = scalar_lea.vmem %s1614_s6, %s1165_s13 }
  0x23   : > { %s472_s24 = scalar_lea.vmem %s1615_s7, %s1460_s29  ;;  %s1481_s27 = scalar_lea.vmem %s1616_s8, %s1165_s13 }
  0x24   : > { %s480_s14 = scalar_lea.vmem %s1617_s9, %s1460_s29 }
  0x25   : > { %v486_v0 = vld [vmem:[%s1608_s0] sm:$0xff]  ;;  %v487_v1 = vld [vmem:[%s1608_s0 + $0x8] sm:$0xff] }
  0x26   : > { %488 = vst [vmem:[#allocation2] sm:$0xff] %v486_v0  ;;  %489 = vst [vmem:[#allocation2 + $0x8] sm:$0xff] %v487_v1 }
  0x27 PF: > { %vm511_vm0 = vcmask 130048   ;;  %v1305_v5 = vld [vmem:[%s1609_s1] sm:$0xff]   ;;  %v1306_v6 = vld [vmem:[%s1609_s1 + $0x8] sm:$0xff]   ;;  %v1360_v7 = vmov 0.0   ;;  %vm1361_vm1 = vmmov 0   ;;  %v1308_v8 = vld [vmem:[%s1472_s19 + $0x38] sm:$0xff]  }
  0x28   : > { %1204 = vmatprep.mubr.msk.bf16.mxu0 %vm511_vm0, %v1305_v5  ;;  %1208 = vmatprep.subr.bf16.mxu1 %v1360_v7  ;;  %v1309_v9 = vld [vmem:[%s1472_s19 + $0x30] sm:$0xff]   ;;  %v1310_v10 = vld [vmem:[%s1472_s19 + $0x28] sm:$0xff]   ;;  %v1311_v11 = vld [vmem:[%s1472_s19 + $0x20] sm:$0xff]   ;;  %vm580_vm2 = vcmask 261120   ;;  %p1150_p2 = scmp.eq.s32.totalorder %s1435_s22, 4 }
  0x29   : > { %1212 = vmatprep.mubr.msk.bf16.mxu1 %vm1361_vm1, %v1360_v7  ;;  %v1312_v12 = vld [vmem:[%s1472_s19 + $0x18] sm:$0xff]   ;;  %v1313_v13 = vld [vmem:[%s1472_s19 + $0x10] sm:$0xff]   ;;  %v497_v19 = vld [vmem:[%s1467_s16] sm:$0xff] }
  0x2a   : > { %v499_v14 = vld [vmem:[%s1467_s16 + $0x10] sm:$0xff]  ;;  %v500_v17 = vld [vmem:[%s1467_s16 + $0x18] sm:$0xff]  ;;  %v498_v21 = vld [vmem:[%s1467_s16 + $0x8] sm:$0xff]  ;;  %s625_s16 = sld [smem:[#allocation3 + %s1435_s22]] }
  0x2b   : > { %v1307_v32 = vld [vmem:[%s1610_s2] sm:$0xff]   ;;  %v1314_v33 = vld [vmem:[%s1472_s19 + $0x8] sm:$0xff]   ;;  %v1316_v35 = vld [vmem:[%s1481_s27 + $0x38] sm:$0xff]  }
  0x2c   : > { %v1315_v34 = vld [vmem:[%s1472_s19] sm:$0xff]   ;;  %v1317_v36 = vld [vmem:[%s1481_s27 + $0x30] sm:$0xff]   ;;  %v1318_v37 = vld [vmem:[%s1481_s27 + $0x28] sm:$0xff]  }
  0x2d   : > { %v1495_v2 = vld [vmem:[#allocation2] sm:$0xff]  ;;  %v1497_v3 = vld [vmem:[#allocation2 + $0x8] sm:$0xff]  ;;  %v1320_v39 = vld [vmem:[%s1481_s27 + $0x18] sm:$0xff]  }
  0x2e   : > { %v492_v4 = vpack.c.bf16 %v1497_v3, %v1495_v2  ;;  %v1319_v38 = vld [vmem:[%s1481_s27 + $0x20] sm:$0xff]   ;;  %v1321_v50 = vld [vmem:[%s1481_s27 + $0x10] sm:$0xff]   ;;  %v1322_v51 = vld [vmem:[%s1481_s27 + $0x8] sm:$0xff]  }
  0x2f   : > { %v1323_v52 = vld [vmem:[%s1481_s27] sm:$0xff]  }
  0x30   : > { %1202 = vmatprep.subr.bf16.mxu0 %v492_v4  ;;  %v626_v40 = vstv %s625_s16  ;;  %v1132_v53 = vld [vmem:[%s472_s24] ss:$0 sm:$0xff] }
  0x31   : > { %1203 = vmatpush3.bf16.msra.mxu0 %v492_v4  ;;  %v627_v42 = vmul.f32 %v626_v40, %v1495_v2  ;;  %v628_v43 = vmul.f32 %v626_v40, %v1497_v3  ;;  %v1141_v63 = vld [vmem:[%s480_s14] ss:$0 sm:$0xff] }
  0x32   : > { %1216 = vmatprep.subr.bf16.mxu0 %v1360_v7 }
  0x34   : > { %1205 = vmatmul.mubr.msk.bf16.vlgmr.msra.gmra.mxu0 %vm511_vm0, %v1306_v6 }
  0x35   : > { %1232 = vmatprep.mubr.msk.bf16.mxu0 %vm1361_vm1, %v1360_v7  ;;  %1217 = vmatpush3.bf16.msra.mxu0 %v1308_v8 }
  0x36   : > { %1218 = vmatprep.subr.bf16.mxu0 %v1360_v7 }
  0x39   : > { %1219 = vmatpush3.bf16.msra.mxu0 %v1309_v9 }
  0x3a   : > { %1220 = vmatprep.subr.bf16.mxu0 %v1360_v7 }
  0x3d   : > { %1221 = vmatpush3.bf16.msra.mxu0 %v1310_v10 }
  0x3e   : > { %1222 = vmatprep.subr.bf16.mxu0 %v1360_v7 }
  0x41   : > { %1223 = vmatpush3.bf16.msra.mxu0 %v1311_v11 }
  0x42   : > { %1224 = vmatprep.subr.bf16.mxu0 %v1360_v7 }
  0x45   : > { %1225 = vmatpush3.bf16.msra.mxu0 %v1312_v12 }
  0x46   : > { %1226 = vmatprep.subr.bf16.mxu0 %v1360_v7 }
  0x49   : > { %1227 = vmatpush3.bf16.msra.mxu0 %v1313_v13 }
  0x4a   : > { %1228 = vmatprep.subr.bf16.mxu0 %v1360_v7 }
  0x4d   : > { %1229 = vmatpush3.bf16.msra.mxu0 %v1314_v33 }
  0x4e   : > { %1230 = vmatprep.subr.bf16.mxu0 %v1360_v7 }
  0x51   : > { %1231 = vmatpush3.bf16.msra.mxu0 %v1315_v34 }
  0xf4   : > { %v1206_v15 = vpop.f32.mrf.mxu0 }
  0xf5   : > { %v561_v18 = vadd.f32 %v1206_v15, %v499_v14 }
  0xf6   : > { %v552_v16 = vpop.f32.mrf.mxu0 }
  0xf7   : > { %v569_v24 = vmax.f32 %v561_v18, 0.0  ;;  %v553_v25 = vadd.f32 %v552_v16, %v497_v19 }
  0xf8   : > { %v1207_v20 = vpop.f32.mrf.mxu0 }
  0xf9   : > { %v564_v22 = vadd.f32 %v1207_v20, %v500_v17  ;;  %v567_v30 = vmax.f32 %v553_v25, 0.0 }
  0xfa   : > { %v555_v23 = vpop.f32.mrf.mxu0 }
  0xfb   : > { %v570_v26 = vmax.f32 %v564_v22, 0.0  ;;  %v556_v27 = vadd.f32 %v555_v23, %v498_v21 }
  0xfd   : > { %v568_v28 = vmax.f32 %v556_v27, 0.0  ;;  %v574_v29 = vpack.c.bf16 %v570_v26, %v569_v24 }
  0xff   : > { %1209 = vmatpush3.bf16.msra.mxu1 %v574_v29  ;;  %v573_v31 = vpack.c.bf16 %v568_v28, %v567_v30 }
 0x100   : > { %1210 = vmatprep.subr.bf16.mxu1 %v1360_v7 }
 0x103   : > { %1211 = vmatpush3.bf16.msra.mxu1 %v573_v31 }
 0x104   : > { %1236 = vmatprep.subr.bf16.mxu1 %v1360_v7 }
 0x106   : > { %1213 = vmatmul.mubr.msk.bf16.vlgmr.msra.gmra.mxu1 %vm580_vm2, %v1307_v32 }
 0x107   : > { %1252 = vmatprep.mubr.msk.bf16.mxu1 %vm1361_vm1, %v1360_v7  ;;  %1237 = vmatpush3.bf16.msra.mxu1 %v1316_v35 }
 0x108   : > { %1238 = vmatprep.subr.bf16.mxu1 %v1360_v7 }
 0x10b   : > { %1239 = vmatpush3.bf16.msra.mxu1 %v1317_v36 }
 0x10c   : > { %1240 = vmatprep.subr.bf16.mxu1 %v1360_v7 }
 0x10f   : > { %1241 = vmatpush3.bf16.msra.mxu1 %v1318_v37 }
 0x110   : > { %1242 = vmatprep.subr.bf16.mxu1 %v1360_v7 }
 0x113   : > { %1243 = vmatpush3.bf16.msra.mxu1 %v1319_v38 }
 0x114   : > { %1244 = vmatprep.subr.bf16.mxu1 %v1360_v7 }
 0x117   : > { %1245 = vmatpush3.bf16.msra.mxu1 %v1320_v39 }
 0x118   : > { %1246 = vmatprep.subr.bf16.mxu1 %v1360_v7 }
 0x11b   : > { %1247 = vmatpush3.bf16.msra.mxu1 %v1321_v50 }
 0x11c   : > { %1248 = vmatprep.subr.bf16.mxu1 %v1360_v7 }
 0x11f   : > { %1249 = vmatpush3.bf16.msra.mxu1 %v1322_v51 }
 0x120   : > { %1250 = vmatprep.subr.bf16.mxu1 %v1360_v7 }
 0x123   : > { %1251 = vmatpush3.bf16.msra.mxu1 %v1323_v52 }
 0x1c6   : > { %v618_v41 = vpop.f32.mrf.mxu1 }
 0x1c7   : > { %v629_v46 = vadd.f32 %v627_v42, %v618_v41 }
 0x1c8   : > { %v1214_v44 = vpop.f32.mrf.mxu1 }
 0x1ca   : > { %v621_v45 = vpop.f32.mrf.mxu1 }
 0x1cb   : > { %v630_v47 = vadd.f32 %v628_v43, %v621_v45 }
 0x1cc   : > { %v1215_v48 = vpop.f32.mrf.mxu1 }
 0x1cd   : > { %v631_v49 = vpack.c.bf16 %v630_v47, %v629_v46 }
 0x1cf   : > { %1233 = vmatmul.mubr.bf16.vlgmr.msra.gmra.mxu0 %v631_v49 }
 0x28f   : > { %v737_v54 = vpop.f32.mrf.mxu0 }
 0x290   : > { %v738_v56 = vadd.f32 %v1132_v53, %v737_v54 }
 0x291   : > { %v1234_v55 = vpop.f32.mrf.mxu0 }
 0x292   : > { %v744_v60 = vmax.f32 %v738_v56, 0.0 }
 0x293   : > { %v740_v57 = vpop.f32.mrf.mxu0 }
 0x294   : > { %v741_v58 = vadd.f32 %v1132_v53, %v740_v57 }
 0x295   : > { %v1235_v59 = vpop.f32.mrf.mxu0 }
 0x296   : > { %v745_v61 = vmax.f32 %v741_v58, 0.0 }
 0x298   : > { %v746_v62 = vpack.c.bf16 %v745_v61, %v744_v60 }
 0x29a   : > { %1253 = vmatmul.mubr.bf16.vlgmr.msra.gmra.mxu1 %v746_v62 }
 0x35a   : > { %v852_v0 = vpop.f32.mrf.mxu1 }
 0x35b   : > { %v853_v1 = vadd.f32 %v1141_v63, %v852_v0 }
 0x35c   : > { %v1254_v2 = vpop.f32.mrf.mxu1  ;;  %862 = sbr.rel (%p1150_p2) target bundleno = 868 (0x364), region = 80 }
 0x35e   : > { %v855_v3 = vpop.f32.mrf.mxu1 }
 0x35f   : > { %v856_v4 = vadd.f32 %v1141_v63, %v855_v3 }
 0x360   : > { %v1255_v5 = vpop.f32.mrf.mxu1 }
 0x361   : > { %v863_v6 = vmax.f32 %v853_v1, 0.0  ;;  %v864_v7 = vmax.f32 %v856_v4, 0.0 }
 0x363   : > { %865 = vst [vmem:[#allocation2] sm:$0xff] %v863_v6  ;;  %866 = vst [vmem:[#allocation2 + $0x8] sm:$0xff] %v864_v7 }
 0x364 PF: > { %p1151_p3 = scmp.ne.s32.totalorder %s1435_s22, 4 }
 0x366   : > { %870 = sbr.rel (%p1151_p3) target bundleno = 1275 (0x4fb), region = 84 }
 0x36b   : > { %v872_v8 = vpack.c.bf16 %v856_v4, %v853_v1  ;;  %v1362_v9 = vmov 0.0   ;;  %vm1363_vm3 = vmmov 0   ;;  %v1324_v10 = vld [vmem:[%s1618_s10 + $0x38] sm:$0xff]   ;;  %v871_v11 = vld [vmem:[%s1611_s3] sm:$0x1]  ;;  %v1325_v12 = vld [vmem:[%s1618_s10 + $0x30] sm:$0xff]  }
 0x36c   : > { %1256 = vmatprep.subr.bf16.mxu0 %v1362_v9  ;;  %1258 = vmatprep.mubr.msk.bf16.mxu0 %vm1363_vm3, %v1362_v9  ;;  %v1326_v13 = vld [vmem:[%s1618_s10 + $0x28] sm:$0xff]   ;;  %v1327_v14 = vld [vmem:[%s1618_s10 + $0x20] sm:$0xff]   ;;  %v1328_v15 = vld [vmem:[%s1618_s10 + $0x18] sm:$0xff]  }
 0x36d   : > { %1257 = vmatpush3.bf16.msra.mxu0 %v872_v8  ;;  %1262 = vmatprep.subr.bf16.mxu1 %v1362_v9  ;;  %v1329_v16 = vld [vmem:[%s1618_s10 + $0x10] sm:$0xff]   ;;  %v1330_v17 = vld [vmem:[%s1618_s10 + $0x8] sm:$0xff]   ;;  %v1331_v18 = vld [vmem:[%s1618_s10] sm:$0xff]  }
 0x36e   : > { %1263 = vmatpush3.bf16.msra.mxu1 %v1324_v10  ;;  %1278 = vmatprep.mubr.msk.bf16.mxu1 %vm1363_vm3, %v1362_v9  ;;  %v1153_v24 = vld [vmem:[%s1619_s11] ss:$0 sm:$0xff] }
 0x36f   : > { %1264 = vmatprep.subr.bf16.mxu1 %v1362_v9 }
 0x370   : > { %1259 = vmatmul.mubr.msk.bf16.vlgmr.msra.gmra.mxu0 %vm511_vm0, %v871_v11 }
 0x372   : > { %1265 = vmatpush3.bf16.msra.mxu1 %v1325_v12 }
 0x373   : > { %1266 = vmatprep.subr.bf16.mxu1 %v1362_v9 }
 0x376   : > { %1267 = vmatpush3.bf16.msra.mxu1 %v1326_v13 }
 0x377   : > { %1268 = vmatprep.subr.bf16.mxu1 %v1362_v9 }
 0x37a   : > { %1269 = vmatpush3.bf16.msra.mxu1 %v1327_v14 }
 0x37b   : > { %1270 = vmatprep.subr.bf16.mxu1 %v1362_v9 }
 0x37e   : > { %1271 = vmatpush3.bf16.msra.mxu1 %v1328_v15 }
 0x37f   : > { %1272 = vmatprep.subr.bf16.mxu1 %v1362_v9 }
 0x382   : > { %1273 = vmatpush3.bf16.msra.mxu1 %v1329_v16 }
 0x383   : > { %1274 = vmatprep.subr.bf16.mxu1 %v1362_v9 }
 0x386   : > { %1275 = vmatpush3.bf16.msra.mxu1 %v1330_v17 }
 0x387   : > { %1276 = vmatprep.subr.bf16.mxu1 %v1362_v9 }
 0x38a   : > { %1277 = vmatpush3.bf16.msra.mxu1 %v1331_v18 }
 0x430   : > { %v910_v19 = vpop.f32.mrf.mxu0 }
 0x431   : > { %v916_v20 = vpack.c.bf16 %v910_v19, %v910_v19 }
 0x432   : > { %v1260_v21 = vpop.f32.mrf.mxu0 }
 0x433   : > { %1279 = vmatmul.mubr.bf16.vlgmr.msra.gmra.mxu1 %v916_v20 }
 0x434   : > { %v913_v22 = vpop.f32.mrf.mxu0 }
 0x436   : > { %v1261_v23 = vpop.f32.mrf.mxu0 }
 0x4f3   : > { %v1022_v25 = vpop.f32.mrf.mxu1 }
 0x4f4   : > { %v1023_v26 = vadd.f32 %v1153_v24, %v1022_v25 }
 0x4f5   : > { %v1280_v27 = vpop.f32.mrf.mxu1 }
 0x4f6   : > { %v1028_v28 = vmax.f32 %v1023_v26, 0.0 }
 0x4f7   : > { %v1025_v29 = vpop.f32.mrf.mxu1 }
 0x4f8   : > { %v1029_v30 = vmin.f32 %v1028_v28, 50.0 }
 0x4f9   : > { %v1281_v31 = vpop.f32.mrf.mxu1 }
 0x4fa   : > { %1030 = vst [vmem:[%s1620_s12] sm:$0x3] %v1029_v30 }
 0x4fb PF: > { %s23_s21 = sadd.s32 1, %s1357_s21  }
 0x4fc   : > { %p20_p4 = scmp.ge.s32.totalorder %s23_s21, 7  }
 0x4fe   :  { %22 = sbr.rel (!%p20_p4) target bundleno = 3 (0x3), region = 123 }
 0x503   :  { %1042 = vsyncpa [#allocation4], 1 }
 0x504   :  { %1044 = vsyncpa [#allocation4 + $0x1], 1 }

</bundles_post_ra>
